<compile_context>
chip_gen: v5e
topology: v5e:2x2
jax: 0.10.0
libtpu: 0.0.40
codegen_flags: <defaults>
</compile_context>

<pallas_src>
import functools

import jax
import jax.numpy as jnp
from jax.experimental import pallas as pl
from jax.experimental.pallas import tpu as pltpu

LANE = 128  # TPU lane width; all feature dims are zero-padded to a multiple of this.


def _mlp_fused_kernel(x_ref, w_ref, gb_ref, o_ref, *, eps, n_layers, batch):
    """Fused forward: n_layers of [Linear(no bias) -> train-mode BatchNorm1d -> exact GELU].

      x_ref:  (B, D)            padded input activations
      w_ref:  (n_layers, D, D)  zero-padded weight stack (row i = layer i, (d_in, d_out) block)
      gb_ref: (2*n_layers, D)   row 2i = gamma_i (pad lanes = 1), row 2i+1 = beta_i (pad = 0)
      o_ref:  (B, D)            padded output activations
    """
    h = x_ref[...]                  # (B, D) f32, padded lanes are 0
    gb = gb_ref[...]                # (2L, D) — tiny, load once
    inv_b = 1.0 / float(batch)

    for i in range(n_layers):
        w = w_ref[i]                # (D, D) static first-axis index
        gamma = gb[2 * i:2 * i + 1, :]      # (1, D) vreg slice
        beta = gb[2 * i + 1:2 * i + 2, :]   # (1, D)

        # Linear on the MXU (bias cancelled exactly by the batch-mean subtraction below).
        y = jnp.dot(h, w, preferred_element_type=jnp.float32)

        # BatchNorm1d, training-mode semantics (biased variance over the batch axis).
        # Two-pass stats for numerical robustness; affine folded into a single scale row.
        mean = jnp.sum(y, axis=0, keepdims=True) * inv_b          # (1, D)
        c = y - mean                                               # (B, D)
        var = jnp.sum(c * c, axis=0, keepdims=True) * inv_b        # (1, D)
        scale = gamma * jax.lax.rsqrt(var + eps)                   # (1, D)
        z = c * scale + beta                                       # (B, D), 2 VALU passes

        # Exact GELU (matches nn.GELU() default): 0.5*z*(1+erf(z/sqrt(2))).
        h = 0.5 * z * (1.0 + jax.lax.erf(z * 0.7071067811865475))

        # Padded lanes: y==0 -> mean=0, var=0, c=0 -> z = beta_pad = 0 -> GELU(0)=0.

    o_ref[...] = h


def init_discriminator_params(key, n_layers, n_neurons, input_dim, output_dim=1):
    """Deterministic synthetic init matching the PyTorch module's layer shapes."""
    params = []
    d_in = input_dim
    for i in range(n_layers):
        d_out = output_dim if i > n_layers - 2 else n_neurons
        key, kw, kb = jax.random.split(key, 3)
        bound = 1.0 / jnp.sqrt(d_in)
        w = jax.random.uniform(kw, (d_in, d_out), jnp.float32, -bound, bound)
        b = jax.random.uniform(kb, (d_out,), jnp.float32, -bound, bound)  # cancelled by train-BN
        gamma = jnp.ones((d_out,), jnp.float32)   # BatchNorm1d weight
        beta = jnp.zeros((d_out,), jnp.float32)   # BatchNorm1d bias
        params.append((w, b, gamma, beta))
        d_in = d_out
    return params


def discriminator_forward(params, x, *, eps=1e-5):
    """Single fused pallas_call over the whole MLP. Returns (B, output_dim)."""
    B, d_in0 = x.shape
    n_layers = len(params)
    true_out_dim = params[-1][0].shape[1]

    # Common padded feature width (lane-aligned); covers the input dim and every layer dim.
    max_dim = max([d_in0] + [w.shape[1] for (w, _, _, _) in params])
    D = ((max_dim + LANE - 1) // LANE) * LANE

    # Pad x to (B, D).
    x_pad = jnp.pad(x.astype(jnp.float32), ((0, 0), (0, D - d_in0)))

    # Pack all layers into two slabs (one DMA each).
    ws, gbs = [], []
    for (w, b, gamma, beta) in params:
        del b  # no-op under training-mode BN mean subtraction
        din, dout = w.shape
        ws.append(jnp.pad(w.astype(jnp.float32), ((0, D - din), (0, D - dout))))
        gbs.append(jnp.pad(gamma.astype(jnp.float32), (0, D - dout), constant_values=1.0))
        gbs.append(jnp.pad(beta.astype(jnp.float32), (0, D - dout)))
    w_stack = jnp.stack(ws)    # (n_layers, D, D)
    gb_stack = jnp.stack(gbs)  # (2*n_layers, D)

    kernel = functools.partial(_mlp_fused_kernel, eps=eps, n_layers=n_layers, batch=B)

    vmem = pl.BlockSpec(memory_space=pltpu.MemorySpace.VMEM)
    out_padded = pl.pallas_call(
        kernel,
        out_shape=jax.ShapeDtypeStruct((B, D), jnp.float32),
        in_specs=[vmem, vmem, vmem],
        out_specs=vmem,
        compiler_params=pltpu.CompilerParams(vmem_limit_bytes=32 << 20),
    )(x_pad, w_stack, gb_stack)

    return out_padded[:, :true_out_dim]


if __name__ == "__main__":
    # hparams: n_layers=3, n_neurons=32, input feature dim (= hparams.output_dim in the spec) = 16
    n_layers, n_neurons, input_dim = 3, 32, 16
    batch = 8

    key = jax.random.PRNGKey(0)
    key, kx = jax.random.split(key)
    x = jax.random.normal(kx, (batch, input_dim), jnp.float32)

    params = init_discriminator_params(key, n_layers, n_neurons, input_dim, output_dim=1)

    out = discriminator_forward(params, x)
    out = jax.block_until_ready(out)
    assert out.shape == (batch, 1), out.shape
    assert bool(jnp.all(jnp.isfinite(out)))
    print("KERNEL_OK")
</pallas_src>

<mosaic_0001>
module attributes {stable_mosaic.version = 11 : i64} {
  func.func @_mlp_fused_kernel(%arg0: memref<8x128xf32, #tpu.memory_space<vmem>>, %arg1: memref<3x128x128xf32, #tpu.memory_space<vmem>>, %arg2: memref<6x128xf32, #tpu.memory_space<vmem>>, %arg3: memref<8x128xf32, #tpu.memory_space<vmem>>) attributes {dimension_semantics = [], scalar_prefetch = 0 : i64, scratch_operands = 0 : i64, tpu.core_type = #tpu.core_type<tc>} {
    %c0 = arith.constant 0 : index
    %c0_0 = arith.constant 0 : index
    %0 = vector.load %arg0[%c0, %c0_0] : memref<8x128xf32, #tpu.memory_space<vmem>>, vector<8x128xf32>
    %c0_1 = arith.constant 0 : index
    %c0_2 = arith.constant 0 : index
    %1 = vector.load %arg2[%c0_1, %c0_2] : memref<6x128xf32, #tpu.memory_space<vmem>>, vector<6x128xf32>
    %c0_3 = arith.constant 0 : index
    %c0_4 = arith.constant 0 : index
    %c0_5 = arith.constant 0 : index
    %2 = vector.load %arg1[%c0_3, %c0_4, %c0_5] : memref<3x128x128xf32, #tpu.memory_space<vmem>>, vector<1x128x128xf32>
    %3 = vector.shape_cast %2 : vector<1x128x128xf32> to vector<128x128xf32>
    %4 = vector.extract_strided_slice %1 {offsets = [0, 0], sizes = [1, 128], strides = [1, 1]} : vector<6x128xf32> to vector<1x128xf32>
    %5 = vector.extract_strided_slice %1 {offsets = [1, 0], sizes = [1, 128], strides = [1, 1]} : vector<6x128xf32> to vector<1x128xf32>
    %cst = arith.constant dense<0.000000e+00> : vector<8x128xf32>
    %6 = tpu.matmul %0, %3, %cst {dimension_numbers = #tpu.dot_dimension_numbers<[1], [0], [0], [1], [0, 0, 1, 1], [], []>} : vector<8x128xf32>, vector<128x128xf32>, vector<8x128xf32> -> vector<8x128xf32>
    %cst_6 = arith.constant dense<0.000000e+00> : vector<128xf32>
    %7 = vector.multi_reduction <add>, %6, %cst_6 [0] : vector<8x128xf32> to vector<128xf32>
    %8 = vector.shape_cast %7 : vector<128xf32> to vector<1x128xf32>
    %cst_7 = arith.constant 1.250000e-01 : f32
    %9 = vector.broadcast %cst_7 : f32 to vector<1x128xf32>
    %10 = arith.mulf %8, %9 : vector<1x128xf32>
    %11 = vector.broadcast %10 : vector<1x128xf32> to vector<8x128xf32>
    %12 = arith.subf %6, %11 : vector<8x128xf32>
    %13 = arith.mulf %12, %12 : vector<8x128xf32>
    %cst_8 = arith.constant dense<0.000000e+00> : vector<128xf32>
    %14 = vector.multi_reduction <add>, %13, %cst_8 [0] : vector<8x128xf32> to vector<128xf32>
    %15 = vector.shape_cast %14 : vector<128xf32> to vector<1x128xf32>
    %cst_9 = arith.constant 1.250000e-01 : f32
    %16 = vector.broadcast %cst_9 : f32 to vector<1x128xf32>
    %17 = arith.mulf %15, %16 : vector<1x128xf32>
    %cst_10 = arith.constant 9.99999974E-6 : f32
    %18 = vector.broadcast %cst_10 : f32 to vector<1x128xf32>
    %19 = arith.addf %17, %18 : vector<1x128xf32>
    %20 = math.rsqrt %19 : vector<1x128xf32>
    %21 = arith.mulf %4, %20 : vector<1x128xf32>
    %22 = vector.broadcast %21 : vector<1x128xf32> to vector<8x128xf32>
    %23 = arith.mulf %12, %22 : vector<8x128xf32>
    %24 = vector.broadcast %5 : vector<1x128xf32> to vector<8x128xf32>
    %25 = arith.addf %23, %24 : vector<8x128xf32>
    %cst_11 = arith.constant 5.000000e-01 : f32
    %26 = vector.broadcast %cst_11 : f32 to vector<8x128xf32>
    %27 = arith.mulf %26, %25 : vector<8x128xf32>
    %cst_12 = arith.constant 0.707106769 : f32
    %28 = vector.broadcast %cst_12 : f32 to vector<8x128xf32>
    %29 = arith.mulf %25, %28 : vector<8x128xf32>
    %30 = math.erf %29 : vector<8x128xf32>
    %cst_13 = arith.constant 1.000000e+00 : f32
    %31 = vector.broadcast %cst_13 : f32 to vector<8x128xf32>
    %32 = arith.addf %31, %30 : vector<8x128xf32>
    %33 = arith.mulf %27, %32 : vector<8x128xf32>
    %c1 = arith.constant 1 : index
    %c0_14 = arith.constant 0 : index
    %c0_15 = arith.constant 0 : index
    %34 = vector.load %arg1[%c1, %c0_14, %c0_15] : memref<3x128x128xf32, #tpu.memory_space<vmem>>, vector<1x128x128xf32>
    %35 = vector.shape_cast %34 : vector<1x128x128xf32> to vector<128x128xf32>
    %36 = vector.extract_strided_slice %1 {offsets = [2, 0], sizes = [1, 128], strides = [1, 1]} : vector<6x128xf32> to vector<1x128xf32>
    %37 = vector.extract_strided_slice %1 {offsets = [3, 0], sizes = [1, 128], strides = [1, 1]} : vector<6x128xf32> to vector<1x128xf32>
    %cst_16 = arith.constant dense<0.000000e+00> : vector<8x128xf32>
    %38 = tpu.matmul %33, %35, %cst_16 {dimension_numbers = #tpu.dot_dimension_numbers<[1], [0], [0], [1], [0, 0, 1, 1], [], []>} : vector<8x128xf32>, vector<128x128xf32>, vector<8x128xf32> -> vector<8x128xf32>
    %cst_17 = arith.constant dense<0.000000e+00> : vector<128xf32>
    %39 = vector.multi_reduction <add>, %38, %cst_17 [0] : vector<8x128xf32> to vector<128xf32>
    %40 = vector.shape_cast %39 : vector<128xf32> to vector<1x128xf32>
    %cst_18 = arith.constant 1.250000e-01 : f32
    %41 = vector.broadcast %cst_18 : f32 to vector<1x128xf32>
    %42 = arith.mulf %40, %41 : vector<1x128xf32>
    %43 = vector.broadcast %42 : vector<1x128xf32> to vector<8x128xf32>
    %44 = arith.subf %38, %43 : vector<8x128xf32>
    %45 = arith.mulf %44, %44 : vector<8x128xf32>
    %cst_19 = arith.constant dense<0.000000e+00> : vector<128xf32>
    %46 = vector.multi_reduction <add>, %45, %cst_19 [0] : vector<8x128xf32> to vector<128xf32>
    %47 = vector.shape_cast %46 : vector<128xf32> to vector<1x128xf32>
    %cst_20 = arith.constant 1.250000e-01 : f32
    %48 = vector.broadcast %cst_20 : f32 to vector<1x128xf32>
    %49 = arith.mulf %47, %48 : vector<1x128xf32>
    %cst_21 = arith.constant 9.99999974E-6 : f32
    %50 = vector.broadcast %cst_21 : f32 to vector<1x128xf32>
    %51 = arith.addf %49, %50 : vector<1x128xf32>
    %52 = math.rsqrt %51 : vector<1x128xf32>
    %53 = arith.mulf %36, %52 : vector<1x128xf32>
    %54 = vector.broadcast %53 : vector<1x128xf32> to vector<8x128xf32>
    %55 = arith.mulf %44, %54 : vector<8x128xf32>
    %56 = vector.broadcast %37 : vector<1x128xf32> to vector<8x128xf32>
    %57 = arith.addf %55, %56 : vector<8x128xf32>
    %cst_22 = arith.constant 5.000000e-01 : f32
    %58 = vector.broadcast %cst_22 : f32 to vector<8x128xf32>
    %59 = arith.mulf %58, %57 : vector<8x128xf32>
    %cst_23 = arith.constant 0.707106769 : f32
    %60 = vector.broadcast %cst_23 : f32 to vector<8x128xf32>
    %61 = arith.mulf %57, %60 : vector<8x128xf32>
    %62 = math.erf %61 : vector<8x128xf32>
    %cst_24 = arith.constant 1.000000e+00 : f32
    %63 = vector.broadcast %cst_24 : f32 to vector<8x128xf32>
    %64 = arith.addf %63, %62 : vector<8x128xf32>
    %65 = arith.mulf %59, %64 : vector<8x128xf32>
    %c2 = arith.constant 2 : index
    %c0_25 = arith.constant 0 : index
    %c0_26 = arith.constant 0 : index
    %66 = vector.load %arg1[%c2, %c0_25, %c0_26] : memref<3x128x128xf32, #tpu.memory_space<vmem>>, vector<1x128x128xf32>
    %67 = vector.shape_cast %66 : vector<1x128x128xf32> to vector<128x128xf32>
    %68 = vector.extract_strided_slice %1 {offsets = [4, 0], sizes = [1, 128], strides = [1, 1]} : vector<6x128xf32> to vector<1x128xf32>
    %69 = vector.extract_strided_slice %1 {offsets = [5, 0], sizes = [1, 128], strides = [1, 1]} : vector<6x128xf32> to vector<1x128xf32>
    %cst_27 = arith.constant dense<0.000000e+00> : vector<8x128xf32>
    %70 = tpu.matmul %65, %67, %cst_27 {dimension_numbers = #tpu.dot_dimension_numbers<[1], [0], [0], [1], [0, 0, 1, 1], [], []>} : vector<8x128xf32>, vector<128x128xf32>, vector<8x128xf32> -> vector<8x128xf32>
    %cst_28 = arith.constant dense<0.000000e+00> : vector<128xf32>
    %71 = vector.multi_reduction <add>, %70, %cst_28 [0] : vector<8x128xf32> to vector<128xf32>
    %72 = vector.shape_cast %71 : vector<128xf32> to vector<1x128xf32>
    %cst_29 = arith.constant 1.250000e-01 : f32
    %73 = vector.broadcast %cst_29 : f32 to vector<1x128xf32>
    %74 = arith.mulf %72, %73 : vector<1x128xf32>
    %75 = vector.broadcast %74 : vector<1x128xf32> to vector<8x128xf32>
    %76 = arith.subf %70, %75 : vector<8x128xf32>
    %77 = arith.mulf %76, %76 : vector<8x128xf32>
    %cst_30 = arith.constant dense<0.000000e+00> : vector<128xf32>
    %78 = vector.multi_reduction <add>, %77, %cst_30 [0] : vector<8x128xf32> to vector<128xf32>
    %79 = vector.shape_cast %78 : vector<128xf32> to vector<1x128xf32>
    %cst_31 = arith.constant 1.250000e-01 : f32
    %80 = vector.broadcast %cst_31 : f32 to vector<1x128xf32>
    %81 = arith.mulf %79, %80 : vector<1x128xf32>
    %cst_32 = arith.constant 9.99999974E-6 : f32
    %82 = vector.broadcast %cst_32 : f32 to vector<1x128xf32>
    %83 = arith.addf %81, %82 : vector<1x128xf32>
    %84 = math.rsqrt %83 : vector<1x128xf32>
    %85 = arith.mulf %68, %84 : vector<1x128xf32>
    %86 = vector.broadcast %85 : vector<1x128xf32> to vector<8x128xf32>
    %87 = arith.mulf %76, %86 : vector<8x128xf32>
    %88 = vector.broadcast %69 : vector<1x128xf32> to vector<8x128xf32>
    %89 = arith.addf %87, %88 : vector<8x128xf32>
    %cst_33 = arith.constant 5.000000e-01 : f32
    %90 = vector.broadcast %cst_33 : f32 to vector<8x128xf32>
    %91 = arith.mulf %90, %89 : vector<8x128xf32>
    %cst_34 = arith.constant 0.707106769 : f32
    %92 = vector.broadcast %cst_34 : f32 to vector<8x128xf32>
    %93 = arith.mulf %89, %92 : vector<8x128xf32>
    %94 = math.erf %93 : vector<8x128xf32>
    %cst_35 = arith.constant 1.000000e+00 : f32
    %95 = vector.broadcast %cst_35 : f32 to vector<8x128xf32>
    %96 = arith.addf %95, %94 : vector<8x128xf32>
    %97 = arith.mulf %91, %96 : vector<8x128xf32>
    %c0_36 = arith.constant 0 : index
    %c0_37 = arith.constant 0 : index
    %98 = vector.load %arg3[%c0_36, %c0_37] : memref<8x128xf32, #tpu.memory_space<vmem>>, vector<8x128xf32>
    tpu.vector_store %arg3[%c0_36, %c0_37], %97 {strides = array<i32>} : memref<8x128xf32, #tpu.memory_space<vmem>>, vector<8x128xf32>,
    return
  }
}

</mosaic_0001>

<bundles_post_ra>
// kernel: tpu_custom_call.1
= control target key start
LH: loop header
LB: loop body
LE: loop exit
PB: predicated region body
PF: predicated region fallthrough
CT: control target
= control target key end

     0   :  { %8 = vsyncpa [#allocation3], 0  ;;  %s586_s0 = inlined_call_operand.hbm [shape: f32[8,128], index: 0, kind: input, shape index: {}]   ;;  %s587_s1 = inlined_call_operand.hbm [shape: f32[3,128,128], index: 1, kind: input, shape index: {}]   ;;  %s588_s2 = inlined_call_operand.hbm [shape: f32[6,128], index: 2, kind: input, shape index: {}]   ;;  %s589_s3 = inlined_call_operand.hbm [shape: f32[8,128], index: 3, kind: output, shape index: {}]  }
   0x1   :  { %9 = vsyncpa [#allocation6], 0  ;;  %s26_s14 = sshll.u32 %s587_s1, 4  ;;  %s27_s14 = int_to_ptr.hbm [resolvable:$true] %s26_s14 }
   0x2   :  { %10 = vsyncpa [#allocation4], 0  ;;  %s540_s15 = smov [#allocation5]   ;;  %s16_s19 = sshll.u32 %s586_s0, 4  ;;  %s17_s19 = int_to_ptr.hbm [resolvable:$true] %s16_s19 }
   0x3   :  { %s28_s16 = sshll.u32 %s540_s15, 4  ;;  %s541_s20 = smov 128   ;;  %s29_s16 = int_to_ptr.vmem [resolvable:$true] %s28_s16 }
   0x4   :  { %s542_s21 = smov 8   ;;  %s543_s22 = smov [#allocation2]  }
   0x5   :  { %34 = dma.hbm_to_vmem [thread:$0]  %s27_s14, 6144, %s29_s16, [#allocation6], %s541_s20, %s541_s20, %s542_s21  }
   0x6   :  { %s18_s23 = sshll.u32 %s543_s22, 4  ;;  %s40_s26 = sshll.u32 %s588_s2, 4  ;;  %s19_s23 = int_to_ptr.vmem [resolvable:$true] %s18_s23  ;;  %s41_s26 = int_to_ptr.hbm [resolvable:$true] %s40_s26 }
   0x7   :  { %21 = dma.hbm_to_vmem [thread:$0]  %s17_s19, 128, %s19_s23, [#allocation3]  }
   0x8   :  { %s544_s1 = smov [#allocation7]  }
   0x9   :  { %s42_s27 = sshll.u32 %s544_s1, 4  ;;  %s43_s27 = int_to_ptr.vmem [resolvable:$true] %s42_s27 }
   0xa   :  { %45 = dma.hbm_to_vmem [thread:$0]  %s41_s26, 128, %s43_s27, [#allocation6]  }
   0xb   :  { %534 = dma.done.wait [#allocation3], 128  }
   0xc   :  { %535 = vsyncadd [#allocation3], 4294967168 }
   0xd   :  { %536 = dma.done.wait [#allocation6], 6272  }
   0xe   :  { %537 = vsyncadd [#allocation6], 4294961024  ;;  %v75_v0 = vld [vmem:[#allocation5 + $0x78] sm:$0xff]  ;;  %v74_v1 = vld [vmem:[#allocation5 + $0x70] sm:$0xff]  ;;  %s545_s0 = smov [#allocation8]   ;;  %s406_s30 = sshll.u32 %s589_s3, 4  ;;  %s407_s30 = int_to_ptr.hbm [resolvable:$true] %s406_s30 }
   0xf   :  { %76 = vmatpush.msra.mxu0 %v75_v0  ;;  %v73_v2 = vld [vmem:[#allocation5 + $0x68] sm:$0xff]  ;;  %v72_v3 = vld [vmem:[#allocation5 + $0x60] sm:$0xff]  ;;  %v71_v4 = vld [vmem:[#allocation5 + $0x58] sm:$0xff]  ;;  %s404_s2 = sshll.u32 %s545_s0, 4  ;;  %s405_s2 = int_to_ptr.vmem [resolvable:$true] %s404_s2 }
  0x10   :  { %v70_v5 = vld [vmem:[#allocation5 + $0x50] sm:$0xff]  ;;  %v69_v6 = vld [vmem:[#allocation5 + $0x48] sm:$0xff]  ;;  %v68_v7 = vld [vmem:[#allocation5 + $0x40] sm:$0xff] }
  0x11   :  { %77 = vmatpush.msra.mxu0 %v74_v1  ;;  %v67_v8 = vld [vmem:[#allocation5 + $0x38] sm:$0xff]  ;;  %v66_v9 = vld [vmem:[#allocation5 + $0x30] sm:$0xff]  ;;  %v65_v10 = vld [vmem:[#allocation5 + $0x28] sm:$0xff] }
  0x12   :  { %v64_v11 = vld [vmem:[#allocation5 + $0x20] sm:$0xff]  ;;  %v63_v12 = vld [vmem:[#allocation5 + $0x18] sm:$0xff]  ;;  %v62_v13 = vld [vmem:[#allocation5 + $0x10] sm:$0xff] }
  0x13   :  { %78 = vmatpush.msra.mxu0 %v73_v2  ;;  %v61_v14 = vld [vmem:[#allocation5 + $0x8] sm:$0xff]  ;;  %v60_v15 = vld [vmem:[#allocation5] sm:$0xff]  ;;  %v58_v16 = vld [vmem:[#allocation2] sm:$0xff] }
  0x14   :  { %v188_v31 = vld [vmem:[#allocation5 + $0xf8] sm:$0xff]  ;;  %v187_v32 = vld [vmem:[#allocation5 + $0xf0] sm:$0xff]  ;;  %v186_v34 = vld [vmem:[#allocation5 + $0xe8] sm:$0xff] }
  0x15   :  { %79 = vmatpush.msra.mxu0 %v72_v3  ;;  %189 = vmatpush.msra.mxu1 %v188_v31  ;;  %v185_v36 = vld [vmem:[#allocation5 + $0xe0] sm:$0xff]  ;;  %v184_v38 = vld [vmem:[#allocation5 + $0xd8] sm:$0xff]  ;;  %v183_v40 = vld [vmem:[#allocation5 + $0xd0] sm:$0xff] }
  0x16   :  { %v182_v41 = vld [vmem:[#allocation5 + $0xc8] sm:$0xff]  ;;  %v181_v42 = vld [vmem:[#allocation5 + $0xc0] sm:$0xff]  ;;  %v180_v43 = vld [vmem:[#allocation5 + $0xb8] sm:$0xff] }
  0x17   :  { %80 = vmatpush.msra.mxu0 %v71_v4  ;;  %190 = vmatpush.msra.mxu1 %v187_v32  ;;  %v179_v45 = vld [vmem:[#allocation5 + $0xb0] sm:$0xff]  ;;  %v178_v47 = vld [vmem:[#allocation5 + $0xa8] sm:$0xff]  ;;  %v177_v49 = vld [vmem:[#allocation5 + $0xa0] sm:$0xff] }
  0x18   :  { %v176_v51 = vld [vmem:[#allocation5 + $0x98] sm:$0xff]  ;;  %v175_v53 = vld [vmem:[#allocation5 + $0x90] sm:$0xff]  ;;  %v575_v54 = vld [vmem:[#allocation7] sm:$0x3f] }
  0x19   :  { %81 = vmatpush.msra.mxu0 %v70_v5  ;;  %191 = vmatpush.msra.mxu1 %v186_v34  ;;  %v174_v56 = vld [vmem:[#allocation5 + $0x88] sm:$0xff]  ;;  %v173_v59 = vld [vmem:[#allocation5 + $0x80] sm:$0xff]  ;;  %v126_v61 = vperm.slane %v575_v54, 1 }
  0x1b   :  { %82 = vmatpush.msra.mxu0 %v69_v6  ;;  %192 = vmatpush.msra.mxu1 %v185_v36 }
  0x1d   :  { %83 = vmatpush.msra.mxu0 %v68_v7  ;;  %193 = vmatpush.msra.mxu1 %v184_v38 }
  0x1f   :  { %84 = vmatpush.msra.mxu0 %v67_v8  ;;  %194 = vmatpush.msra.mxu1 %v183_v40 }
  0x21   :  { %85 = vmatpush.msra.mxu0 %v66_v9  ;;  %195 = vmatpush.msra.mxu1 %v182_v41 }
  0x23   :  { %86 = vmatpush.msra.mxu0 %v65_v10  ;;  %196 = vmatpush.msra.mxu1 %v181_v42 }
  0x25   :  { %87 = vmatpush.msra.mxu0 %v64_v11  ;;  %197 = vmatpush.msra.mxu1 %v180_v43 }
  0x27   :  { %88 = vmatpush.msra.mxu0 %v63_v12  ;;  %198 = vmatpush.msra.mxu1 %v179_v45 }
  0x29   :  { %89 = vmatpush.msra.mxu0 %v62_v13  ;;  %199 = vmatpush.msra.mxu1 %v178_v47 }
  0x2b   :  { %90 = vmatpush.msra.mxu0 %v61_v14  ;;  %200 = vmatpush.msra.mxu1 %v177_v49 }
  0x2d   :  { %91 = vmatpush.msra.mxu0 %v60_v15  ;;  %201 = vmatpush.msra.mxu1 %v176_v51 }
  0x2e   :  { %92 = vmatmul.f32.vlgmr.msra.gmra.mxu0 %v58_v16 }
  0x2f   :  { %202 = vmatpush.msra.mxu1 %v175_v53  ;;  %v301_v53 = vld [vmem:[#allocation5 + $0x178] sm:$0xff] }
  0x30   :  { %302 = vmatpush.msra.mxu2 %v301_v53 }
  0x31   :  { %203 = vmatpush.msra.mxu1 %v174_v56 }
  0x33   :  { %204 = vmatpush.msra.mxu1 %v173_v59  ;;  %v298_v59 = vld [vmem:[#allocation5 + $0x160] sm:$0xff] }
  0xab   :  { %v93_v17 = vpop.f32.mrf.mxu0 }
  0xac   :  { %v96_v18 = vrot.slane %v93_v17, 4 }
  0xae   :  { %v97_v19 = vadd.f32 %v96_v18, %v93_v17 }
  0xb0   :  { %v98_v20 = vrot.slane %v97_v19, 2 }
  0xb2   :  { %v99_v21 = vadd.f32 %v98_v20, %v97_v19 }
  0xb4   :  { %v100_v22 = vrot.slane %v99_v21, 1 }
  0xb6   :  { %v101_v23 = vadd.f32 %v100_v22, %v99_v21 }
  0xb8   :  { %v102_v24 = vmul.f32 0.125, %v101_v23 }
  0xba   :  { %v103_v25 = vsub.f32 %v93_v17, %v102_v24 }
  0xbc   :  { %v104_v26 = vmul.f32 %v103_v25, %v103_v25 }
  0xbe   :  { %v105_v27 = vrot.slane %v104_v26, 4 }
  0xc0   :  { %v106_v28 = vadd.f32 %v105_v27, %v104_v26 }
  0xc2   :  { %v107_v29 = vrot.slane %v106_v28, 2 }
  0xc4   :  { %v108_v30 = vadd.f32 %v107_v29, %v106_v28 }
  0xc6   :  { %v109_v33 = vrot.slane %v108_v30, 1 }
  0xc8   :  { %v110_v35 = vadd.f32 %v109_v33, %v108_v30 }
  0xca   :  { %v111_v37 = vmul.f32 0.125, %v110_v35 }
  0xcc   :  { %v112_v39 = vadd.f32 1e-05, %v111_v37 }
  0xce   :  { %426 = vrsqrt.f32 %v112_v39  ;;  %vm119_vm1 = vweird.f32 %v112_v39 }
  0xd4   :  { %v427_v44 = vpop.eup %426 }
  0xd5   :  { %v114_v46 = vmul.f32 %v427_v44, %v112_v39  ;;  %vm120_vm0 = vweird.f32 %v427_v44 }
  0xd6   :  { %vm121_vm2 = vmor %vm119_vm1, %vm120_vm0 }
  0xd7   :  { %v115_v48 = vmul.f32 %v427_v44, %v114_v46 }
  0xd9   :  { %v116_v50 = vmul.f32 0.5, %v115_v48 }
  0xdb   :  { %v117_v52 = vsub.f32 1.5, %v116_v50 }
  0xdd   :  { %v118_v55 = vmul.f32 %v427_v44, %v117_v52 }
  0xdf   :  { %v122_v57 = vsel %vm121_vm2, %v427_v44, %v118_v55  ;;  %v300_v55 = vld [vmem:[#allocation5 + $0x170] sm:$0xff] }
  0xe0   :  { %v123_v58 = vmul.f32 %v122_v57, %v575_v54  ;;  %v299_v57 = vld [vmem:[#allocation5 + $0x168] sm:$0xff]  ;;  %303 = vmatpush.msra.mxu2 %v300_v55 }
  0xe2   :  { %v124_v60 = vperm.slane %v123_v58, 0  ;;  %304 = vmatpush.msra.mxu2 %v299_v57 }
  0xe4   :  { %v125_v62 = vmul.f32 %v124_v60, %v103_v25  ;;  %305 = vmatpush.msra.mxu2 %v298_v59 }
  0xe6   :  { %v127_v63 = vadd.f32 %v126_v61, %v125_v62  ;;  %v297_v61 = vld [vmem:[#allocation5 + $0x158] sm:$0xff] }
  0xe7   :  { %306 = vmatpush.msra.mxu2 %v297_v61 }
  0xe8   :  { %v129_v0 = vmul.f32 0.70710677, %v127_v63  ;;  %v128_v36 = vmul.f32 0.5, %v127_v63  ;;  %v296_v63 = vld [vmem:[#allocation5 + $0x150] sm:$0xff] }
  0xe9   :  { %307 = vmatpush.msra.mxu2 %v296_v63 }
  0xea   :  { %v130_v1 = vmul.f32 %v129_v0, %v129_v0 }
  0xec   :  { %v131_v2 = vmin.f32 %v130_v1, 16.0  ;;  %v294_v1 = vld [vmem:[#allocation5 + $0x140] sm:$0xff] }
  0xee   :  { %v132_v3 = vmul.f32 2.1237322e-06, %v131_v2  ;;  %v143_v4 = vmul.f32 3.8918573e-05, %v131_v2 }
  0xf0   :  { %v133_v5 = vadd.f32 0.00028619796, %v132_v3  ;;  %v144_v6 = vadd.f32 0.001143296, %v143_v4  ;;  %v292_v4 = vld [vmem:[#allocation5 + $0x130] sm:$0xff] }
  0xf2   :  { %v134_v7 = vmul.f32 %v133_v5, %v131_v2  ;;  %v145_v8 = vmul.f32 %v144_v6, %v131_v2  ;;  %v291_v6 = vld [vmem:[#allocation5 + $0x128] sm:$0xff] }
  0xf4   :  { %v146_v9 = vadd.f32 0.014752088, %v145_v8  ;;  %v135_v10 = vadd.f32 0.0036580483, %v134_v7  ;;  %v290_v8 = vld [vmem:[#allocation5 + $0x120] sm:$0xff] }
  0xf6   :  { %v147_v11 = vmul.f32 %v146_v9, %v131_v2  ;;  %v136_v13 = vmul.f32 %v135_v10, %v131_v2  ;;  %v289_v10 = vld [vmem:[#allocation5 + $0x118] sm:$0xff] }
  0xf8   :  { %v148_v12 = vadd.f32 0.112945676, %v147_v11  ;;  %v137_v16 = vadd.f32 0.05243302, %v136_v13 }
  0xfa   :  { %v149_v14 = vmul.f32 %v148_v12, %v131_v2  ;;  %v138_v19 = vmul.f32 %v137_v16, %v131_v2  ;;  %v288_v12 = vld [vmem:[#allocation5 + $0x110] sm:$0xff] }
  0xfc   :  { %v150_v15 = vadd.f32 0.4994258, %v149_v14  ;;  %v139_v20 = vadd.f32 0.18741608, %v138_v19  ;;  %v287_v14 = vld [vmem:[#allocation5 + $0x108] sm:$0xff]  ;;  %v239_v19 = vperm.slane %v575_v54, 3 }
  0xfe   :  { %v151_v17 = vmul.f32 %v150_v15, %v131_v2  ;;  %v140_v22 = vmul.f32 %v139_v20, %v131_v2  ;;  %v293_v2 = vld [vmem:[#allocation5 + $0x138] sm:$0xff] }
 0x100   :  { %v152_v18 = vadd.f32 1.0, %v151_v17  ;;  %v141_v26 = vadd.f32 1.1283791, %v140_v22  ;;  %v286_v17 = vld [vmem:[#allocation5 + $0x100] sm:$0xff] }
 0x102   :  { %428 = vrcp.f32 %v152_v18  ;;  %v164_v25 = vand.u32 2147483648, %v152_v18  ;;  %v162_v28 = vand.u32 2147483647, %v152_v18  ;;  %vm158_vm4 = vweird.f32 %v152_v18 }
 0x103   :  { %v142_v31 = vmul.f32 %v141_v26, %v129_v0  ;;  %v295_v0 = vld [vmem:[#allocation5 + $0x148] sm:$0xff] }
 0x104   :  { %v165_v30 = vor.u32 1.1754944e-38, %v164_v25  ;;  %vm163_vm6 = vcmp.eq.f32.partialorder %v162_v28, 8.507059e+37  ;;  %308 = vmatpush.msra.mxu2 %v295_v0 }
 0x106   :  { %309 = vmatpush.msra.mxu2 %v294_v1 }
 0x108   :  { %v429_v21 = vpop.eup %428  ;;  %310 = vmatpush.msra.mxu2 %v293_v2 }
 0x109   :  { %v154_v23 = vmul.f32 %v429_v21, %v152_v18  ;;  %vm159_vm3 = vweird.f32 %v429_v21 }
 0x10a   :  { %vm160_vm5 = vmor %vm158_vm4, %vm159_vm3  ;;  %311 = vmatpush.msra.mxu2 %v292_v4 }
 0x10b   :  { %v155_v24 = vsub.f32 1.0, %v154_v23 }
 0x10c   :  { %312 = vmatpush.msra.mxu2 %v291_v6 }
 0x10d   :  { %v156_v27 = vmul.f32 %v429_v21, %v155_v24 }
 0x10e   :  { %313 = vmatpush.msra.mxu2 %v290_v8 }
 0x10f   :  { %v157_v29 = vadd.f32 %v429_v21, %v156_v27 }
 0x110   :  { %314 = vmatpush.msra.mxu2 %v289_v10 }
 0x111   :  { %v161_v32 = vsel %vm160_vm5, %v429_v21, %v157_v29 }
 0x112   :  { %v166_v33 = vsel %vm163_vm6, %v165_v30, %v161_v32  ;;  %315 = vmatpush.msra.mxu2 %v288_v12 }
 0x113   :  { %v167_v34 = vmul.f32 %v166_v33, %v142_v31 }
 0x114   :  { %316 = vmatpush.msra.mxu2 %v287_v14 }
 0x115   :  { %v417_v35 = vclamps-f32 %v167_v34, 1.0 }
 0x116   :  { %317 = vmatpush.msra.mxu2 %v286_v17 }
 0x117   :  { %v170_v37 = vadd.f32 1.0, %v417_v35 }
 0x119   :  { %v171_v38 = vmul.f32 %v170_v37, %v128_v36 }
 0x11b   :  { %205 = vmatmul.f32.vlgmr.msra.gmra.mxu1 %v171_v38 }
 0x198   :  { %v206_v39 = vpop.f32.mrf.mxu1 }
 0x199   :  { %v209_v40 = vrot.slane %v206_v39, 4 }
 0x19b   :  { %v210_v41 = vadd.f32 %v209_v40, %v206_v39 }
 0x19d   :  { %v211_v42 = vrot.slane %v210_v41, 2 }
 0x19f   :  { %v212_v43 = vadd.f32 %v211_v42, %v210_v41 }
 0x1a1   :  { %v213_v44 = vrot.slane %v212_v43, 1 }
 0x1a3   :  { %v214_v45 = vadd.f32 %v213_v44, %v212_v43 }
 0x1a5   :  { %v215_v46 = vmul.f32 0.125, %v214_v45 }
 0x1a7   :  { %v216_v47 = vsub.f32 %v206_v39, %v215_v46 }
 0x1a9   :  { %v217_v48 = vmul.f32 %v216_v47, %v216_v47 }
 0x1ab   :  { %v218_v49 = vrot.slane %v217_v48, 4 }
 0x1ad   :  { %v219_v50 = vadd.f32 %v218_v49, %v217_v48 }
 0x1af   :  { %v220_v51 = vrot.slane %v219_v50, 2 }
 0x1b1   :  { %v221_v52 = vadd.f32 %v220_v51, %v219_v50 }
 0x1b3   :  { %v222_v56 = vrot.slane %v221_v52, 1 }
 0x1b5   :  { %v223_v58 = vadd.f32 %v222_v56, %v221_v52 }
 0x1b7   :  { %v224_v60 = vmul.f32 0.125, %v223_v58 }
 0x1b9   :  { %v225_v62 = vadd.f32 1e-05, %v224_v60 }
 0x1bb   :  { %430 = vrsqrt.f32 %v225_v62  ;;  %vm232_vm8 = vweird.f32 %v225_v62 }
 0x1c1   :  { %v431_v3 = vpop.eup %430 }
 0x1c2   :  { %v227_v5 = vmul.f32 %v431_v3, %v225_v62  ;;  %vm233_vm7 = vweird.f32 %v431_v3 }
 0x1c3   :  { %vm234_vm9 = vmor %vm232_vm8, %vm233_vm7 }
 0x1c4   :  { %v228_v7 = vmul.f32 %v431_v3, %v227_v5 }
 0x1c6   :  { %v229_v9 = vmul.f32 0.5, %v228_v7 }
 0x1c8   :  { %v230_v11 = vsub.f32 1.5, %v229_v9 }
 0x1ca   :  { %v231_v13 = vmul.f32 %v431_v3, %v230_v11 }
 0x1cc   :  { %v235_v15 = vsel %vm234_vm9, %v431_v3, %v231_v13 }
 0x1cd   :  { %v236_v16 = vmul.f32 %v235_v15, %v575_v54 }
 0x1cf   :  { %v237_v18 = vperm.slane %v236_v16, 2 }
 0x1d1   :  { %v238_v20 = vmul.f32 %v237_v18, %v216_v47 }
 0x1d3   :  { %v240_v21 = vadd.f32 %v239_v19, %v238_v20 }
 0x1d5   :  { %v242_v22 = vmul.f32 0.70710677, %v240_v21  ;;  %v241_v59 = vmul.f32 0.5, %v240_v21 }
 0x1d7   :  { %v243_v23 = vmul.f32 %v242_v22, %v242_v22 }
 0x1d9   :  { %v244_v24 = vmin.f32 %v243_v23, 16.0 }
 0x1db   :  { %v245_v25 = vmul.f32 2.1237322e-06, %v244_v24  ;;  %v256_v26 = vmul.f32 3.8918573e-05, %v244_v24 }
 0x1dd   :  { %v246_v27 = vadd.f32 0.00028619796, %v245_v25  ;;  %v257_v28 = vadd.f32 0.001143296, %v256_v26  ;;  %v352_v25 = vperm.slane %v575_v54, 5 }
 0x1df   :  { %v247_v29 = vmul.f32 %v246_v27, %v244_v24  ;;  %v258_v30 = vmul.f32 %v257_v28, %v244_v24 }
 0x1e1   :  { %v259_v31 = vadd.f32 0.014752088, %v258_v30  ;;  %v248_v32 = vadd.f32 0.0036580483, %v247_v29 }
 0x1e3   :  { %v260_v33 = vmul.f32 %v259_v31, %v244_v24  ;;  %v249_v35 = vmul.f32 %v248_v32, %v244_v24 }
 0x1e5   :  { %v261_v34 = vadd.f32 0.112945676, %v260_v33  ;;  %v250_v38 = vadd.f32 0.05243302, %v249_v35 }
 0x1e7   :  { %v262_v36 = vmul.f32 %v261_v34, %v244_v24  ;;  %v251_v41 = vmul.f32 %v250_v38, %v244_v24 }
 0x1e9   :  { %v263_v37 = vadd.f32 0.4994258, %v262_v36  ;;  %v252_v42 = vadd.f32 0.18741608, %v251_v41 }
 0x1eb   :  { %v264_v39 = vmul.f32 %v263_v37, %v244_v24  ;;  %v253_v44 = vmul.f32 %v252_v42, %v244_v24 }
 0x1ed   :  { %v265_v40 = vadd.f32 1.0, %v264_v39  ;;  %v254_v48 = vadd.f32 1.1283791, %v253_v44 }
 0x1ef   :  { %432 = vrcp.f32 %v265_v40  ;;  %v277_v47 = vand.u32 2147483648, %v265_v40  ;;  %v275_v50 = vand.u32 2147483647, %v265_v40  ;;  %vm271_vm11 = vweird.f32 %v265_v40 }
 0x1f0   :  { %v255_v53 = vmul.f32 %v254_v48, %v242_v22 }
 0x1f1   :  { %v278_v52 = vor.u32 1.1754944e-38, %v277_v47  ;;  %vm276_vm13 = vcmp.eq.f32.partialorder %v275_v50, 8.507059e+37 }
 0x1f5   :  { %v433_v43 = vpop.eup %432 }
 0x1f6   :  { %v267_v45 = vmul.f32 %v433_v43, %v265_v40  ;;  %vm272_vm10 = vweird.f32 %v433_v43 }
 0x1f7   :  { %vm273_vm12 = vmor %vm271_vm11, %vm272_vm10 }
 0x1f8   :  { %v268_v46 = vsub.f32 1.0, %v267_v45 }
 0x1fa   :  { %v269_v49 = vmul.f32 %v433_v43, %v268_v46 }
 0x1fc   :  { %v270_v51 = vadd.f32 %v433_v43, %v269_v49 }
 0x1fe   :  { %v274_v55 = vsel %vm273_vm12, %v433_v43, %v270_v51 }
 0x1ff   :  { %v279_v56 = vsel %vm276_vm13, %v278_v52, %v274_v55 }
 0x200   :  { %v280_v57 = vmul.f32 %v279_v56, %v255_v53 }
 0x202   :  { %v418_v58 = vclamps-f32 %v280_v57, 1.0 }
 0x204   :  { %v283_v60 = vadd.f32 1.0, %v418_v58 }
 0x206   :  { %v284_v61 = vmul.f32 %v283_v60, %v241_v59 }
 0x208   :  { %318 = vmatmul.f32.vlgmr.msra.gmra.mxu2 %v284_v61 }
 0x28b   :  { %v319_v62 = vpop.f32.mrf.mxu2 }
 0x28c   :  { %v322_v63 = vrot.slane %v319_v62, 4 }
 0x28e   :  { %v323_v0 = vadd.f32 %v322_v63, %v319_v62 }
 0x290   :  { %v324_v1 = vrot.slane %v323_v0, 2 }
 0x292   :  { %v325_v2 = vadd.f32 %v324_v1, %v323_v0 }
 0x294   :  { %v326_v3 = vrot.slane %v325_v2, 1 }
 0x296   :  { %v327_v4 = vadd.f32 %v326_v3, %v325_v2 }
 0x298   :  { %v328_v5 = vmul.f32 0.125, %v327_v4 }
 0x29a   :  { %v329_v6 = vsub.f32 %v319_v62, %v328_v5 }
 0x29c   :  { %v330_v7 = vmul.f32 %v329_v6, %v329_v6 }
 0x29e   :  { %v331_v8 = vrot.slane %v330_v7, 4 }
 0x2a0   :  { %v332_v9 = vadd.f32 %v331_v8, %v330_v7 }
 0x2a2   :  { %v333_v10 = vrot.slane %v332_v9, 2 }
 0x2a4   :  { %v334_v11 = vadd.f32 %v333_v10, %v332_v9 }
 0x2a6   :  { %v335_v12 = vrot.slane %v334_v11, 1 }
 0x2a8   :  { %v336_v13 = vadd.f32 %v335_v12, %v334_v11 }
 0x2aa   :  { %v337_v14 = vmul.f32 0.125, %v336_v13 }
 0x2ac   :  { %v338_v15 = vadd.f32 1e-05, %v337_v14 }
 0x2ae   :  { %434 = vrsqrt.f32 %v338_v15  ;;  %vm345_vm15 = vweird.f32 %v338_v15 }
 0x2b4   :  { %v435_v16 = vpop.eup %434 }
 0x2b5   :  { %v340_v17 = vmul.f32 %v435_v16, %v338_v15  ;;  %vm346_vm14 = vweird.f32 %v435_v16 }
 0x2b6   :  { %vm347_vm0 = vmor %vm345_vm15, %vm346_vm14 }
 0x2b7   :  { %v341_v18 = vmul.f32 %v435_v16, %v340_v17 }
 0x2b9   :  { %v342_v19 = vmul.f32 0.5, %v341_v18 }
 0x2bb   :  { %v343_v20 = vsub.f32 1.5, %v342_v19 }
 0x2bd   :  { %v344_v21 = vmul.f32 %v435_v16, %v343_v20 }
 0x2bf   :  { %v348_v22 = vsel %vm347_vm0, %v435_v16, %v344_v21 }
 0x2c0   :  { %v349_v23 = vmul.f32 %v348_v22, %v575_v54 }
 0x2c2   :  { %v350_v24 = vperm.slane %v349_v23, 4 }
 0x2c4   :  { %v351_v26 = vmul.f32 %v350_v24, %v329_v6 }
 0x2c6   :  { %v353_v27 = vadd.f32 %v352_v25, %v351_v26 }
 0x2c8   :  { %v355_v28 = vmul.f32 0.70710677, %v353_v27  ;;  %v354_v0 = vmul.f32 0.5, %v353_v27 }
 0x2ca   :  { %v356_v29 = vmul.f32 %v355_v28, %v355_v28 }
 0x2cc   :  { %v357_v30 = vmin.f32 %v356_v29, 16.0 }
 0x2ce   :  { %v358_v31 = vmul.f32 2.1237322e-06, %v357_v30  ;;  %v369_v32 = vmul.f32 3.8918573e-05, %v357_v30 }
 0x2d0   :  { %v359_v33 = vadd.f32 0.00028619796, %v358_v31  ;;  %v370_v34 = vadd.f32 0.001143296, %v369_v32 }
 0x2d2   :  { %v360_v35 = vmul.f32 %v359_v33, %v357_v30  ;;  %v371_v36 = vmul.f32 %v370_v34, %v357_v30 }
 0x2d4   :  { %v372_v37 = vadd.f32 0.014752088, %v371_v36  ;;  %v361_v38 = vadd.f32 0.0036580483, %v360_v35 }
 0x2d6   :  { %v373_v39 = vmul.f32 %v372_v37, %v357_v30  ;;  %v362_v41 = vmul.f32 %v361_v38, %v357_v30 }
 0x2d8   :  { %v374_v40 = vadd.f32 0.112945676, %v373_v39  ;;  %v363_v44 = vadd.f32 0.05243302, %v362_v41 }
 0x2da   :  { %v375_v42 = vmul.f32 %v374_v40, %v357_v30  ;;  %v364_v46 = vmul.f32 %v363_v44, %v357_v30 }
 0x2dc   :  { %v376_v43 = vadd.f32 0.4994258, %v375_v42  ;;  %v365_v47 = vadd.f32 0.18741608, %v364_v46 }
 0x2de   :  { %v377_v54 = vmul.f32 %v376_v43, %v357_v30  ;;  %v366_v49 = vmul.f32 %v365_v47, %v357_v30 }
 0x2e0   :  { %v378_v45 = vadd.f32 1.0, %v377_v54  ;;  %v367_v53 = vadd.f32 1.1283791, %v366_v49 }
 0x2e2   :  { %436 = vrcp.f32 %v378_v45  ;;  %v390_v52 = vand.u32 2147483648, %v378_v45  ;;  %v388_v56 = vand.u32 2147483647, %v378_v45  ;;  %vm384_vm2 = vweird.f32 %v378_v45 }
 0x2e3   :  { %v368_v59 = vmul.f32 %v367_v53, %v355_v28 }
 0x2e4   :  { %v391_v58 = vor.u32 1.1754944e-38, %v390_v52  ;;  %vm389_vm4 = vcmp.eq.f32.partialorder %v388_v56, 8.507059e+37 }
 0x2e8   :  { %v437_v48 = vpop.eup %436 }
 0x2e9   :  { %v380_v50 = vmul.f32 %v437_v48, %v378_v45  ;;  %vm385_vm1 = vweird.f32 %v437_v48 }
 0x2ea   :  { %vm386_vm3 = vmor %vm384_vm2, %vm385_vm1 }
 0x2eb   :  { %v381_v51 = vsub.f32 1.0, %v380_v50 }
 0x2ed   :  { %v382_v55 = vmul.f32 %v437_v48, %v381_v51 }
 0x2ef   :  { %v383_v57 = vadd.f32 %v437_v48, %v382_v55 }
 0x2f1   :  { %v387_v60 = vsel %vm386_vm3, %v437_v48, %v383_v57 }
 0x2f2   :  { %v392_v61 = vsel %vm389_vm4, %v391_v58, %v387_v60 }
 0x2f3   :  { %v393_v62 = vmul.f32 %v392_v61, %v368_v59 }
 0x2f5   :  { %v419_v63 = vclamps-f32 %v393_v62, 1.0 }
 0x2f7   :  { %v396_v1 = vadd.f32 1.0, %v419_v63 }
 0x2f9   :  { %v397_v2 = vmul.f32 %v396_v1, %v354_v0 }
 0x2fb   :  { %398 = vst [vmem:[#allocation8] sm:$0xff] %v397_v2 }
 0x2fc   :  { %409 = dma.vmem_to_hbm [thread:$0]  %s405_s2, 128, %s407_s30, [#allocation4]  }
 0x2fd   :  { %538 = dma.done.wait [#allocation4], 128  }
 0x2fe   :  { %539 = vsyncadd [#allocation4], 4294967168 }
 0x2ff   :  { %414 = vsyncpa [#allocation3], 1 }
 0x300   :  { %415 = vsyncpa [#allocation6], 1 }
 0x301   :  { %416 = vsyncpa [#allocation4], 1 }

</bundles_post_ra>
